<compile_context>
chip_gen: v5e
topology: v5e:2x2
jax: 0.10.0
libtpu: 0.0.40
codegen_flags: <defaults>
</compile_context>

<pallas_src>
import jax
import jax.numpy as jnp
from jax.experimental import pallas as pl
from jax.experimental.pallas import tpu as pltpu


def _round_up(a, b):
    return (a + b - 1) // b * b


def _mlp_kernel(x_ref, w1t_ref, b1_ref, w23_ref, o_ref):
    # fc1 (+ folded residual / constant columns), computed transposed so the
    # per-row result is lane-major:  hT = W1_aug^T @ x^T -> (h_pad, tm). MXU,
    # bf16 operands, f32 accumulation.
    hT = jax.lax.dot_general(
        w1t_ref[...], x_ref[...], (((1,), (1,)), ((), ())),
        preferred_element_type=jnp.float32)
    hT = jnp.maximum(hT + b1_ref[...], 0.0)      # bias + ReLU (dropout = identity)
    # Folded fc2->fc3 projection (+ residual taps + constant): sublane reduce
    # on VPU/XLU, MXU stays free. Output is a lane-dense (1, tm) row.
    o_ref[...] = jnp.sum(hT * w23_ref[...], axis=0, keepdims=True)


def _fold_params(params, input_dtype):
    """Fold fc2/fc3/residual/constant into (W1_aug^T, b1_col, w23_aug)."""
    w1, b1, w2, b2, w3, b3 = params
    d, h = w1.shape                                   # h == 4*d
    w23 = w2 @ w3                                     # (h, 1)
    c = (b2 @ w3 + b3).reshape(1, 1)                  # scalar constant b2@W3 + b3
    one = jnp.ones((1, 1), w1.dtype)
    # Residual x@w3 via relu(a) - relu(-a) == a; constant via relu(0*x + 1) == 1.
    w1_aug = jnp.concatenate([w1, w3, -w3, jnp.zeros((d, 1), w1.dtype)], axis=1)  # (d, h+3)
    b1_aug = jnp.concatenate([b1, jnp.zeros((1, 2), b1.dtype), one], axis=1)      # (1, h+3)
    w23_aug = jnp.concatenate([w23, one, -one, c], axis=0)                        # (h+3, 1)
    # Pad hidden axis to a multiple of 8 (sublane alignment); zeros are inert.
    h_aug = h + 3
    h_pad = _round_up(h_aug, 8)
    if h_pad != h_aug:
        pad = h_pad - h_aug
        w1_aug = jnp.pad(w1_aug, ((0, 0), (0, pad)))
        b1_aug = jnp.pad(b1_aug, ((0, 0), (0, pad)))
        w23_aug = jnp.pad(w23_aug, ((0, pad), (0, 0)))
    w1t_aug = w1_aug.T.astype(input_dtype)            # (h_pad, d) MXU operand
    b1_col = b1_aug.reshape(h_pad, 1).astype(jnp.float32)
    w23_aug = w23_aug.astype(jnp.float32)
    return w1t_aug, b1_col, w23_aug


# Below this many rows a single grid step wins (per-step overhead ~0.35 us
# dominates); above it we force >= 2 parallel steps so both v7x TCs get work.
_MIN_ROWS_FOR_SPLIT = 1024


def _plan_tiles(n, tm):
    """Balanced row tiling: (n_tiles, tm_eff, n_pad) with < 128 pad rows/step."""
    if n < _MIN_ROWS_FOR_SPLIT:
        return 1, n, n
    n_tiles = max(pl.cdiv(n, tm), 2)                  # >= 2 steps for megacore
    tm_eff = _round_up(pl.cdiv(n, n_tiles), 128)      # balanced, lane-aligned
    return n_tiles, tm_eff, tm_eff * n_tiles


def _vmem_limit(tm_eff, d, h_pad, in_bytes):
    """Derive the VMEM budget from actual buffers (double-buffered by Pallas)."""
    x_buf = 2 * tm_eff * d * in_bytes                 # x tile
    o_buf = 2 * tm_eff * 4                            # (1, tm) f32 output row
    w_buf = 2 * (h_pad * d * in_bytes + 2 * h_pad * 4)  # weights / bias / proj
    h_tmp = h_pad * tm_eff * 4                        # f32 hT intermediate
    total = x_buf + o_buf + w_buf + h_tmp
    return int(min(max(2 * total, 8 << 20), 32 << 20))


def mlp_forward(x, params, *, tm=4096, input_dtype=jnp.bfloat16):
    """x: (..., d_model). Returns (..., 1). Inference mode (dropout = identity)."""
    w1t_aug, b1_col, w23_aug = _fold_params(params, input_dtype)
    h_pad, d = w1t_aug.shape
    lead = x.shape[:-1]
    x2 = x.reshape(-1, d).astype(input_dtype)
    n = x2.shape[0]

    n_tiles, tm_eff, n_pad = _plan_tiles(n, tm)
    if n_pad != n:
        x2 = jnp.pad(x2, ((0, n_pad - n), (0, 0)))

    in_bytes = jnp.dtype(input_dtype).itemsize
    out_row = pl.pallas_call(
        _mlp_kernel,
        out_shape=jax.ShapeDtypeStruct((1, n_pad), jnp.float32),
        grid_spec=pltpu.PrefetchScalarGridSpec(
            num_scalar_prefetch=0,
            grid=(n_tiles,),
            in_specs=[
                pl.BlockSpec((tm_eff, d), lambda i: (i, 0)),   # x rows (bf16)
                pl.BlockSpec((h_pad, d), lambda i: (0, 0)),    # W1_aug^T (replicated)
                pl.BlockSpec((h_pad, 1), lambda i: (0, 0)),    # b1 column (f32)
                pl.BlockSpec((h_pad, 1), lambda i: (0, 0)),    # W2@W3 + taps + const (f32)
            ],
            out_specs=pl.BlockSpec((1, tm_eff), lambda i: (0, i)),  # lane-dense row
        ),
        compiler_params=pltpu.CompilerParams(
            dimension_semantics=("parallel",),
            vmem_limit_bytes=_vmem_limit(tm_eff, d, h_pad, in_bytes),
        ),
    )(x2, w1t_aug, b1_col, w23_aug)

    return out_row[0, :n].reshape(*lead, 1)


def init_params(key, d_model):
    """Deterministic init mimicking nn.Linear's U(-1/sqrt(fan_in), 1/sqrt(fan_in))."""
    h = 4 * d_model
    ks = jax.random.split(key, 6)

    def lin(kw, kb, fan_in, fan_out):
        bound = 1.0 / jnp.sqrt(jnp.float32(fan_in))
        w = jax.random.uniform(kw, (fan_in, fan_out), jnp.float32, -bound, bound)
        b = jax.random.uniform(kb, (1, fan_out), jnp.float32, -bound, bound)
        return w, b

    w1, b1 = lin(ks[0], ks[1], d_model, h)
    w2, b2 = lin(ks[2], ks[3], h, d_model)
    w3, b3 = lin(ks[4], ks[5], d_model, 1)
    return (w1, b1, w2, b2, w3, b3)


def mlp_reference(x, params):
    """Pure-JAX f32 reference (unfused) for correctness check."""
    w1, b1, w2, b2, w3, b3 = params
    h = jnp.maximum(x @ w1 + b1[0], 0.0)
    y = h @ w2 + b2[0]
    y = x + y
    return y @ w3 + b3[0]


if __name__ == "__main__":
    key = jax.random.PRNGKey(0)
    k_x, k_x2, k_p = jax.random.split(key, 3)

    d_model = 32
    params = init_params(k_p, d_model)

    # Small shape consistent with the module (single-tile path).
    batch, seq = 2, 8
    x = jax.random.normal(k_x, (batch, seq, d_model), jnp.float32)
    ref = mlp_reference(x.reshape(-1, d_model), params).reshape(batch, seq, 1)

    # f32 feed: exact up to reassociation of the (exact) algebraic fusion.
    out_f32 = jax.block_until_ready(mlp_forward(x, params, input_dtype=jnp.float32))
    assert out_f32.shape == (batch, seq, 1)
    assert jnp.allclose(out_f32, ref, atol=1e-4, rtol=1e-4)

    # Default bf16 MXU feed (f32 accumulation): looser tolerance.
    out_bf16 = jax.block_until_ready(mlp_forward(x, params))
    assert out_bf16.shape == (batch, seq, 1)
    assert jnp.allclose(out_bf16, ref, atol=3e-2, rtol=3e-2)

    # Multi-step grid with balanced tiles + ragged-row padding:
    # n = 1170 -> 2 parallel steps of 640 rows (110 padded rows total).
    batch2, seq2 = 9, 130
    xl = jax.random.normal(k_x2, (batch2, seq2, d_model), jnp.float32)
    ref2 = mlp_reference(xl.reshape(-1, d_model), params).reshape(batch2, seq2, 1)
    out2 = jax.block_until_ready(mlp_forward(xl, params))
    assert out2.shape == (batch2, seq2, 1)
    assert jnp.allclose(out2, ref2, atol=3e-2, rtol=3e-2)

    print("KERNEL_OK")
</pallas_src>

<mosaic_0001>
module attributes {stable_mosaic.version = 11 : i64} {
  func.func @_mlp_kernel(%arg0: i32, %arg1: memref<16x32xf32, #tpu.memory_space<vmem>>, %arg2: memref<136x32xf32, #tpu.memory_space<vmem>>, %arg3: memref<136x1xf32, #tpu.memory_space<vmem>>, %arg4: memref<136x1xf32, #tpu.memory_space<vmem>>, %arg5: memref<1x16xf32, #tpu.memory_space<vmem>>) attributes {dimension_semantics = [#tpu.dimension_semantics<parallel>], iteration_bounds = array<i64: 1>, scalar_prefetch = 0 : i64, scratch_operands = 0 : i64, tpu.core_type = #tpu.core_type<tc>, window_params = [{transform_indices = @transform_0, window_bounds = array<i64: 16, 32>}, {pipeline_mode = #tpu.pipeline_mode<synchronous>, transform_indices = @transform_1, window_bounds = array<i64: 136, 32>}, {pipeline_mode = #tpu.pipeline_mode<synchronous>, transform_indices = @transform_2, window_bounds = array<i64: 136, 1>}, {pipeline_mode = #tpu.pipeline_mode<synchronous>, transform_indices = @transform_3, window_bounds = array<i64: 136, 1>}, {transform_indices = @transform_4, window_bounds = array<i64: 1, 16>}]} {
    %c0 = arith.constant 0 : index
    %c0_0 = arith.constant 0 : index
    %0 = vector.load %arg2[%c0, %c0_0] : memref<136x32xf32, #tpu.memory_space<vmem>>, vector<136x32xf32>
    %c0_1 = arith.constant 0 : index
    %c0_2 = arith.constant 0 : index
    %1 = vector.load %arg1[%c0_1, %c0_2] : memref<16x32xf32, #tpu.memory_space<vmem>>, vector<16x32xf32>
    %cst = arith.constant dense<0.000000e+00> : vector<136x16xf32>
    %2 = tpu.matmul %0, %1, %cst {dimension_numbers = #tpu.dot_dimension_numbers<[1], [1], [0], [0], [0, 0, 1, 0], [], []>} : vector<136x32xf32>, vector<16x32xf32>, vector<136x16xf32> -> vector<136x16xf32>
    %c0_3 = arith.constant 0 : index
    %c0_4 = arith.constant 0 : index
    %3 = vector.load %arg3[%c0_3, %c0_4] : memref<136x1xf32, #tpu.memory_space<vmem>>, vector<136x1xf32>
    %4 = vector.broadcast %3 : vector<136x1xf32> to vector<136x16xf32>
    %5 = arith.addf %2, %4 : vector<136x16xf32>
    %cst_5 = arith.constant 0.000000e+00 : f32
    %6 = vector.broadcast %cst_5 : f32 to vector<136x16xf32>
    %7 = arith.maximumf %5, %6 : vector<136x16xf32>
    %c0_6 = arith.constant 0 : index
    %c0_7 = arith.constant 0 : index
    %8 = vector.load %arg4[%c0_6, %c0_7] : memref<136x1xf32, #tpu.memory_space<vmem>>, vector<136x1xf32>
    %9 = vector.broadcast %8 : vector<136x1xf32> to vector<136x16xf32>
    %10 = arith.mulf %7, %9 : vector<136x16xf32>
    %cst_8 = arith.constant dense<0.000000e+00> : vector<16xf32>
    %11 = vector.multi_reduction <add>, %10, %cst_8 [0] : vector<136x16xf32> to vector<16xf32>
    %12 = vector.shape_cast %11 : vector<16xf32> to vector<1x16xf32>
    %c0_9 = arith.constant 0 : index
    %c0_10 = arith.constant 0 : index
    %13 = vector.load %arg5[%c0_9, %c0_10] : memref<1x16xf32, #tpu.memory_space<vmem>>, vector<1x16xf32>
    tpu.vector_store %arg5[%c0_9, %c0_10], %12 {strides = array<i32>} : memref<1x16xf32, #tpu.memory_space<vmem>>, vector<1x16xf32>,
    return
  }
  func.func @transform_0(%arg0: i32) -> (i32, i32) {
    %c0_i32 = arith.constant 0 : i32
    %c0_i32_0 = arith.constant 0 : i32
    return %arg0, %c0_i32 : i32, i32
  }
  func.func @transform_1(%arg0: i32) -> (i32, i32) {
    %c0_i32 = arith.constant 0 : i32
    %c0_i32_0 = arith.constant 0 : i32
    %c0_i32_1 = arith.constant 0 : i32
    return %c0_i32, %c0_i32_0 : i32, i32
  }
  func.func @transform_2(%arg0: i32) -> (i32, i32) {
    %c0_i32 = arith.constant 0 : i32
    %c0_i32_0 = arith.constant 0 : i32
    %c0_i32_1 = arith.constant 0 : i32
    return %c0_i32, %c0_i32_0 : i32, i32
  }
  func.func @transform_3(%arg0: i32) -> (i32, i32) {
    %c0_i32 = arith.constant 0 : i32
    %c0_i32_0 = arith.constant 0 : i32
    %c0_i32_1 = arith.constant 0 : i32
    return %c0_i32, %c0_i32_0 : i32, i32
  }
  func.func @transform_4(%arg0: i32) -> (i32, i32) {
    %c0_i32 = arith.constant 0 : i32
    %c0_i32_0 = arith.constant 0 : i32
    return %c0_i32, %arg0 : i32, i32
  }
}

</mosaic_0001>

<bundles_post_ra>
// kernel: tpu_custom_call.1
= control target key start
LH: loop header
LB: loop body
LE: loop exit
PB: predicated region body
PF: predicated region fallthrough
CT: control target
= control target key end

     0   :  { %vm139_vm0 = vcmask 261120   ;;  %v515_v1 = vmov 0   ;;  %s770_s0 = inlined_call_operand.vmem [shape: f32[16,32], index: 0, kind: input, shape index: {}]   ;;  %s771_s1 = inlined_call_operand.vmem [shape: f32[136,32], index: 1, kind: input, shape index: {}]   ;;  %s772_s2 = inlined_call_operand.vmem [shape: f32[136,1], index: 2, kind: input, shape index: {}]   ;;  %s773_s3 = inlined_call_operand.vmem [shape: f32[136,1], index: 3, kind: input, shape index: {}]   ;;  %s774_s4 = inlined_call_operand.hbm [shape: f32[1,16], index: 4, kind: output, shape index: {}]  }
   0x1   :  { %v36_v0 = vld [vmem:[%s770_s0 + $0x8] sm:$0xff]  ;;  %488 = vset.pattern.permute.xlu2 %v515_v1  ;;  %487 = vset.pattern.permute.xlu1 %v515_v1  ;;  %v41_v2 = vld [vmem:[%s772_s2 + $0x20] sm:$0xff]  ;;  %v39_v3 = vld [vmem:[%s772_s2 + $0x10] sm:$0xff] }
   0x2   :  { %486 = vset.pattern.permute.xlu0 %v515_v1  ;;  %459 = vmatpush.xpose.msk.msra.mxu0 %vm139_vm0, %v36_v0  ;;  %v37_v4 = vld [vmem:[%s772_s2] sm:$0xff]  ;;  %v31_v9 = vld [vmem:[%s771_s1 + $0x68] sm:$0xff]  ;;  %v40_v11 = vld [vmem:[%s772_s2 + $0x18] sm:$0xff] }
   0x3   :  { %478 = vmatpush.xpose.msk.msra.mxu1 %vm139_vm0, %v36_v0  ;;  %479 = vmatpush.xpose.msk.msra.mxu2 %vm139_vm0, %v36_v0  ;;  %v35_v5 = vld [vmem:[%s770_s0] sm:$0xff]  ;;  %v42_v10 = vld [vmem:[%s772_s2 + $0x28] sm:$0xff] }
   0x4   :  { %480 = vmatpush.xpose.msk.msra.mxu3 %vm139_vm0, %v36_v0  ;;  %76 = vperm.xlu2 %488, %v41_v2   ;;  %v18_v6 = vld [vmem:[%s771_s1] sm:$0xff]  ;;  %v38_v12 = vld [vmem:[%s772_s2 + $0x8] sm:$0xff] }
   0x5   :  { %66 = vperm.xlu1 %487, %v39_v3   ;;  %56 = vperm.xlu0 %486, %v37_v4   ;;  %v22_v7 = vld [vmem:[%s771_s1 + $0x20] sm:$0xff] }
   0x6   :  { %460 = vmatpush.xpose.msk.msra.mxu0 %vm139_vm0, %v35_v5  ;;  %v26_v8 = vld [vmem:[%s771_s1 + $0x40] sm:$0xff] }
   0x7   :  { %481 = vmatpush.xpose.msk.msra.mxu1 %vm139_vm0, %v35_v5  ;;  %482 = vmatpush.xpose.msk.msra.mxu2 %vm139_vm0, %v35_v5 }
   0x8   :  { %483 = vmatpush.xpose.msk.msra.mxu3 %vm139_vm0, %v35_v5 }
   0x9   :  { %461 = vmatmul.msk.f32.vlgmr.msra.gmra.mxu0 %vm139_vm0, %v18_v6 }
   0xa   :  { %465 = vmatmul.msk.f32.vlgmr.msra.gmra.mxu1 %vm139_vm0, %v22_v7  ;;  %469 = vmatmul.msk.f32.vlgmr.msra.gmra.mxu2 %vm139_vm0, %v26_v8 }
   0xb   :  { %474 = vmatmul.msk.f32.vlgmr.msra.gmra.mxu3 %vm139_vm0, %v31_v9 }
   0xc   :  { %9 = vsyncpa [#allocation3], 0  ;;  %81 = vperm.xlu2 %488, %v42_v10   ;;  %v19_v13 = vld [vmem:[%s771_s1 + $0x8] sm:$0xff]  ;;  %v32_v16 = vld [vmem:[%s771_s1 + $0x70] sm:$0xff]  ;;  %vm401_vm1 = vcmask 130048   ;;  %s450_s13 = sshll.u32 %s774_s4, 4  ;;  %s451_s13 = int_to_ptr.hbm [resolvable:$true] %s450_s13 }
   0xd   :  { %71 = vperm.xlu1 %487, %v40_v11   ;;  %61 = vperm.xlu0 %486, %v38_v12   ;;  %v23_v14 = vld [vmem:[%s771_s1 + $0x28] sm:$0xff]  ;;  %v45_v17 = vld [vmem:[%s772_s2 + $0x40] sm:$0xff]  ;;  %v44_v18 = vld [vmem:[%s772_s2 + $0x38] sm:$0xff]  ;;  %vm441_vm2 = vcmask 122880  }
   0xe   :  { %v27_v15 = vld [vmem:[%s771_s1 + $0x48] sm:$0xff]  ;;  %v43_v19 = vld [vmem:[%s772_s2 + $0x30] sm:$0xff]  ;;  %v33_v23 = vld [vmem:[%s771_s1 + $0x78] sm:$0xff] }
   0xf   :  { %v20_v20 = vld [vmem:[%s771_s1 + $0x10] sm:$0xff]  ;;  %v48_v24 = vld [vmem:[%s772_s2 + $0x58] sm:$0xff]  ;;  %v46_v26 = vld [vmem:[%s772_s2 + $0x48] sm:$0xff] }
  0x10   :  { %v24_v21 = vld [vmem:[%s771_s1 + $0x30] sm:$0xff]  ;;  %v21_v27 = vld [vmem:[%s771_s1 + $0x18] sm:$0xff]  ;;  %v34_v30 = vld [vmem:[%s771_s1 + $0x80] sm:$0xff] }
  0x11   :  { %462 = vmatmul.msk.f32.gmra.mxu0 %vm139_vm0, %v19_v13  ;;  %v28_v22 = vld [vmem:[%s771_s1 + $0x50] sm:$0xff]  ;;  %v25_v28 = vld [vmem:[%s771_s1 + $0x38] sm:$0xff]  ;;  %v50_v32 = vld [vmem:[%s772_s2 + $0x68] sm:$0xff] }
  0x12   :  { %466 = vmatmul.msk.f32.gmra.mxu1 %vm139_vm0, %v23_v14  ;;  %470 = vmatmul.msk.f32.gmra.mxu2 %vm139_vm0, %v27_v15  ;;  %v47_v25 = vld [vmem:[%s772_s2 + $0x50] sm:$0xff]  ;;  %v29_v29 = vld [vmem:[%s771_s1 + $0x58] sm:$0xff]  ;;  %v49_v33 = vld [vmem:[%s772_s2 + $0x60] sm:$0xff] }
  0x13   :  { %475 = vmatmul.msk.f32.gmra.mxu3 %vm139_vm0, %v32_v16  ;;  %v51_v31 = vld [vmem:[%s772_s2 + $0x70] sm:$0xff]  ;;  %v30_v34 = vld [vmem:[%s771_s1 + $0x60] sm:$0xff]  ;;  %v52_v37 = vld [vmem:[%s772_s2 + $0x78] sm:$0xff] }
  0x14   :  { %96 = vperm.xlu2 %488, %v45_v17   ;;  %v282_v35 = vld [vmem:[%s773_s3] sm:$0xff]  ;;  %v285_v38 = vld [vmem:[%s773_s3 + $0x18] sm:$0xff]  ;;  %v284_v39 = vld [vmem:[%s773_s3 + $0x10] sm:$0xff] }
  0x15   :  { %91 = vperm.xlu1 %487, %v44_v18   ;;  %86 = vperm.xlu0 %486, %v43_v19   ;;  %v53_v36 = vld [vmem:[%s772_s2 + $0x80] sm:$0xff]  ;;  %v283_v40 = vld [vmem:[%s773_s3 + $0x8] sm:$0xff]  ;;  %v288_v41 = vld [vmem:[%s773_s3 + $0x30] sm:$0xff] }
  0x16   :  { %v287_v42 = vld [vmem:[%s773_s3 + $0x28] sm:$0xff]  ;;  %v286_v43 = vld [vmem:[%s773_s3 + $0x20] sm:$0xff]  ;;  %v289_v46 = vld [vmem:[%s773_s3 + $0x38] sm:$0xff] }
  0x17   :  { %v291_v44 = vld [vmem:[%s773_s3 + $0x48] sm:$0xff]  ;;  %v290_v45 = vld [vmem:[%s773_s3 + $0x40] sm:$0xff]  ;;  %v293_v48 = vld [vmem:[%s773_s3 + $0x58] sm:$0xff] }
  0x18   :  { %v294_v47 = vld [vmem:[%s773_s3 + $0x60] sm:$0xff]  ;;  %v292_v49 = vld [vmem:[%s773_s3 + $0x50] sm:$0xff]  ;;  %v297_v50 = vld [vmem:[%s773_s3 + $0x78] sm:$0xff] }
  0x19   :  { %463 = vmatmul.msk.f32.gmra.mxu0 %vm139_vm0, %v20_v20  ;;  %v296_v51 = vld [vmem:[%s773_s3 + $0x70] sm:$0xff]  ;;  %v295_v52 = vld [vmem:[%s773_s3 + $0x68] sm:$0xff]  ;;  %v298_v53 = vld [vmem:[%s773_s3 + $0x80] sm:$0xff]  ;;  %s516_s3 = smov [#allocation2]  }
  0x1a   :  { %467 = vmatmul.msk.f32.gmra.mxu1 %vm139_vm0, %v24_v21  ;;  %471 = vmatmul.msk.f32.gmra.mxu2 %vm139_vm0, %v28_v22  ;;  %s448_s10 = sshll.u32 %s516_s3, 4  ;;  %s449_s10 = int_to_ptr.vmem [resolvable:$true] %s448_s10 }
  0x1b   :  { %476 = vmatmul.msk.f32.gmra.mxu3 %vm139_vm0, %v33_v23 }
  0x1c   :  { %111 = vperm.xlu2 %488, %v48_v24  }
  0x1d   :  { %106 = vperm.xlu1 %487, %v47_v25   ;;  %101 = vperm.xlu0 %486, %v46_v26  }
  0x21   :  { %464 = vmatmul.msk.f32.gmra.mxu0 %vm139_vm0, %v21_v27 }
  0x22   :  { %468 = vmatmul.msk.f32.gmra.mxu1 %vm139_vm0, %v25_v28  ;;  %472 = vmatmul.msk.f32.gmra.mxu2 %vm139_vm0, %v29_v29 }
  0x23   :  { %477 = vmatmul.msk.f32.gmra.mxu3 %vm139_vm0, %v34_v30 }
  0x24   :  { %126 = vperm.xlu2 %488, %v51_v31  }
  0x25   :  { %121 = vperm.xlu1 %487, %v50_v32   ;;  %116 = vperm.xlu0 %486, %v49_v33  }
  0x2a   :  { %473 = vmatmul.msk.f32.gmra.mxu2 %vm139_vm0, %v30_v34 }
  0x2c   :  { %301 = vperm.xlu2 %488, %v282_v35  }
  0x2d   :  { %136 = vperm.xlu1 %487, %v53_v36   ;;  %131 = vperm.xlu0 %486, %v52_v37  }
  0x34   :  { %316 = vperm.xlu2 %488, %v285_v38  }
  0x35   :  { %311 = vperm.xlu1 %487, %v284_v39   ;;  %306 = vperm.xlu0 %486, %v283_v40  }
  0x3c   :  { %331 = vperm.xlu2 %488, %v288_v41  }
  0x3d   :  { %326 = vperm.xlu1 %487, %v287_v42   ;;  %321 = vperm.xlu0 %486, %v286_v43  }
  0x44   :  { %346 = vperm.xlu2 %488, %v291_v44  }
  0x45   :  { %341 = vperm.xlu1 %487, %v290_v45   ;;  %336 = vperm.xlu0 %486, %v289_v46  }
  0x4c   :  { %361 = vperm.xlu2 %488, %v294_v47  }
  0x4d   :  { %356 = vperm.xlu1 %487, %v293_v48   ;;  %351 = vperm.xlu0 %486, %v292_v49  }
  0x54   :  { %376 = vperm.xlu2 %488, %v297_v50  }
  0x55   :  { %371 = vperm.xlu1 %487, %v296_v51   ;;  %366 = vperm.xlu0 %486, %v295_v52  }
  0x5d   :  { %381 = vperm.xlu0 %486, %v298_v53  }
  0x5e   :  { %v77_v54 = vpop.permute.xlu2 %76 }
  0x66   :  { %v82_v55 = vpop.permute.xlu2 %81 }
  0x6e   :  { %v97_v58 = vpop.permute.xlu2 %96 }
  0x76   :  { %v726_v61 = vpop.permute.xlu2 %111 }
  0x77   :  { %v67_v56 = vpop.permute.xlu1 %66  ;;  %v57_v57 = vpop.permute.xlu0 %56 }
  0x7e   :  { %v728_v1 = vpop.permute.xlu2 %126 }
  0x7f   :  { %v72_v59 = vpop.permute.xlu1 %71  ;;  %v62_v60 = vpop.permute.xlu0 %61 }
  0x86   :  { %v214_v62 = vpop.f32.mrf.mxu0  ;;  %v302_v7 = vpop.permute.xlu2 %301 }
  0x87   :  { %v92_v63 = vpop.permute.xlu1 %91  ;;  %v87_v0 = vpop.permute.xlu0 %86  ;;  %v215_v13 = vadd.f32 %v214_v62, %v57_v57 }
  0x88   :  { %v226_v2 = vpop.f32.mrf.mxu1 }
  0x89   :  { %v265_v18 = vmax.f32 %v215_v13, 0.0  ;;  %v227_v33 = vadd.f32 %v226_v2, %v77_v54 }
  0x8b   :  { %v384_v24 = vmul.f32 %v302_v7, %v265_v18  ;;  %v269_v43 = vmax.f32 %v227_v33, 0.0 }
  0x8d   :  { %v238_v5 = vpop.f32.mrf.mxu2  ;;  %v402_v36 = vsel %vm401_vm1, %v384_v24, 0.0 }
  0x8e   :  { %v217_v6 = vpop.f32.mrf.mxu0  ;;  %v317_v16 = vpop.permute.xlu2 %316  ;;  %v239_v54 = vadd.f32 %v238_v5, %v97_v58 }
  0x8f   :  { %v730_v3 = vpop.permute.xlu1 %106  ;;  %v102_v4 = vpop.permute.xlu0 %101  ;;  %v218_v19 = vadd.f32 %v217_v6, %v62_v60 }
  0x90   :  { %v229_v11 = vpop.f32.mrf.mxu1  ;;  %v740_v29 = vpop.f32.mrf.mxu3  ;;  %v273_v6 = vmax.f32 %v239_v54, 0.0 }
  0x91   :  { %v266_v25 = vmax.f32 %v218_v19, 0.0  ;;  %v230_v34 = vadd.f32 %v229_v11, %v82_v55 }
  0x93   :  { %v270_v44 = vmax.f32 %v230_v34, 0.0 }
  0x95   :  { %v241_v12 = vpop.f32.mrf.mxu2 }
  0x96   :  { %v220_v10 = vpop.f32.mrf.mxu0  ;;  %v332_v35 = vpop.permute.xlu2 %331  ;;  %v242_v7 = vadd.f32 %v241_v12, %v102_v4 }
  0x97   :  { %v732_v8 = vpop.permute.xlu1 %121  ;;  %v734_v9 = vpop.permute.xlu0 %116  ;;  %v221_v20 = vadd.f32 %v220_v10, %v67_v56 }
  0x98   :  { %v232_v21 = vpop.f32.mrf.mxu1  ;;  %v256_v55 = vpop.f32.mrf.mxu3 }
  0x99   :  { %v267_v26 = vmax.f32 %v221_v20, 0.0  ;;  %v233_v39 = vadd.f32 %v232_v21, %v87_v0 }
  0x9b   :  { %v271_v49 = vmax.f32 %v233_v39, 0.0 }
  0x9d   :  { %v244_v22 = vpop.f32.mrf.mxu2  ;;  %v390_v60 = vmul.f32 %v332_v35, %v271_v49  ;;  %v257_v35 = vadd.f32 %v256_v55, %v728_v1 }
  0x9e   :  { %v223_v17 = vpop.f32.mrf.mxu0  ;;  %v347_v62 = vpop.permute.xlu2 %346  ;;  %v245_v19 = vadd.f32 %v244_v22, %v730_v3 }
  0x9f   :  { %v736_v14 = vpop.permute.xlu1 %136  ;;  %v738_v15 = vpop.permute.xlu0 %131  ;;  %v224_v23 = vadd.f32 %v223_v17, %v72_v59 }
  0xa0   :  { %v235_v45 = vpop.f32.mrf.mxu1  ;;  %v259_v24 = vpop.f32.mrf.mxu3 }
  0xa1   :  { %v268_v30 = vmax.f32 %v224_v23, 0.0  ;;  %v236_v56 = vadd.f32 %v235_v45, %v92_v63  ;;  %v274_v63 = vmax.f32 %v242_v7, 0.0 }
  0xa3   :  { %v387_v40 = vmul.f32 %v317_v16, %v268_v30  ;;  %v272_v10 = vmax.f32 %v236_v56, 0.0  ;;  %v413_v16 = vsel %vm401_vm1, %v390_v60, 0.0 }
  0xa5   :  { %v247_v46 = vpop.f32.mrf.mxu2  ;;  %v407_v50 = vsel %vm401_vm1, %v387_v40, 0.0 }
  0xa6   :  { %v248_v20 = vadd.f32 %v247_v46, %v726_v61  ;;  %v362_v30 = vpop.permute.xlu2 %361 }
  0xa7   :  { %v312_v27 = vpop.permute.xlu1 %311  ;;  %v307_v28 = vpop.permute.xlu0 %306 }
  0xa8   :  { %v386_v31 = vmul.f32 %v312_v27, %v267_v26  ;;  %v385_v32 = vmul.f32 %v307_v28, %v266_v25  ;;  %v393_v25 = vmul.f32 %v347_v62, %v274_v63  ;;  %v275_v27 = vmax.f32 %v245_v19, 0.0 }
  0xa9   :  { %v276_v28 = vmax.f32 %v248_v20, 0.0 }
  0xaa   :  { %v403_v37 = vsel %vm401_vm1, %v385_v32, 0.0  ;;  %v405_v41 = vsel %vm401_vm1, %v386_v31, 0.0  ;;  %v419_v33 = vsel %vm401_vm1, %v393_v25, 0.0 }
  0xab   :  { %v404_v38 = vadd.f32 %v403_v37, %v402_v36  ;;  %v254_v36 = vadd.f32 %v740_v29, %v732_v8 }
  0xad   :  { %v406_v42 = vadd.f32 %v405_v41, %v404_v38  ;;  %v250_v58 = vpop.f32.mrf.mxu2  ;;  %v279_v41 = vmax.f32 %v257_v35, 0.0 }
  0xae   :  { %v251_v4 = vadd.f32 %v250_v58, %v734_v9  ;;  %v377_v49 = vpop.permute.xlu2 %376 }
  0xaf   :  { %v327_v47 = vpop.permute.xlu1 %326  ;;  %v322_v48 = vpop.permute.xlu0 %321  ;;  %v408_v53 = vadd.f32 %v407_v50, %v406_v42  ;;  %v278_v42 = vmax.f32 %v254_v36, 0.0 }
  0xb0   :  { %v389_v51 = vmul.f32 %v327_v47, %v270_v44  ;;  %v388_v52 = vmul.f32 %v322_v48, %v269_v43  ;;  %v277_v3 = vmax.f32 %v251_v4, 0.0  ;;  %v260_v43 = vadd.f32 %v259_v24, %v738_v15  ;;  %v262_v44 = vpop.f32.mrf.mxu3 }
  0xb1   :  { %v263_v50 = vadd.f32 %v262_v44, %v736_v14 }
  0xb2   :  { %v409_v57 = vsel %vm401_vm1, %v388_v52, 0.0  ;;  %v411_v0 = vsel %vm401_vm1, %v389_v51, 0.0  ;;  %v396_v38 = vmul.f32 %v362_v30, %v277_v3  ;;  %v280_v29 = vmax.f32 %v260_v43, 0.0 }
  0xb3   :  { %v410_v59 = vadd.f32 %v409_v57, %v408_v53  ;;  %v281_v15 = vmax.f32 %v263_v50, 0.0 }
  0xb4   :  { %v425_v47 = vsel %vm401_vm1, %v396_v38, 0.0  ;;  %v399_v53 = vmul.f32 %v377_v49, %v280_v29 }
  0xb5   :  { %v412_v2 = vadd.f32 %v411_v0, %v410_v59 }
  0xb6   :  { %v431_v57 = vsel %vm401_vm1, %v399_v53, 0.0 }
  0xb7   :  { %v342_v11 = vpop.permute.xlu1 %341  ;;  %v337_v13 = vpop.permute.xlu0 %336  ;;  %v414_v5 = vadd.f32 %v413_v16, %v412_v2 }
  0xb8   :  { %v392_v17 = vmul.f32 %v342_v11, %v273_v6  ;;  %v391_v18 = vmul.f32 %v337_v13, %v272_v10 }
  0xba   :  { %v415_v21 = vsel %vm401_vm1, %v391_v18, 0.0  ;;  %v417_v12 = vsel %vm401_vm1, %v392_v17, 0.0 }
  0xbb   :  { %v416_v23 = vadd.f32 %v415_v21, %v414_v5 }
  0xbd   :  { %v418_v26 = vadd.f32 %v417_v12, %v416_v23 }
  0xbf   :  { %v357_v31 = vpop.permute.xlu1 %356  ;;  %v352_v32 = vpop.permute.xlu0 %351  ;;  %v420_v34 = vadd.f32 %v419_v33, %v418_v26 }
  0xc0   :  { %v395_v22 = vmul.f32 %v357_v31, %v276_v28  ;;  %v394_v61 = vmul.f32 %v352_v32, %v275_v27 }
  0xc2   :  { %v421_v9 = vsel %vm401_vm1, %v394_v61, 0.0  ;;  %v423_v39 = vsel %vm401_vm1, %v395_v22, 0.0 }
  0xc3   :  { %v422_v37 = vadd.f32 %v421_v9, %v420_v34 }
  0xc5   :  { %v424_v40 = vadd.f32 %v423_v39, %v422_v37 }
  0xc7   :  { %v372_v45 = vpop.permute.xlu1 %371  ;;  %v367_v46 = vpop.permute.xlu0 %366  ;;  %v426_v8 = vadd.f32 %v425_v47, %v424_v40 }
  0xc8   :  { %v398_v1 = vmul.f32 %v372_v45, %v279_v41  ;;  %v397_v48 = vmul.f32 %v367_v46, %v278_v42 }
  0xca   :  { %v427_v51 = vsel %vm401_vm1, %v397_v48, 0.0  ;;  %v429_v54 = vsel %vm401_vm1, %v398_v1, 0.0 }
  0xcb   :  { %v428_v52 = vadd.f32 %v427_v51, %v426_v8 }
  0xcd   :  { %v430_v55 = vadd.f32 %v429_v54, %v428_v52 }
  0xcf   :  { %v382_v56 = vpop.permute.xlu0 %381  ;;  %v432_v60 = vadd.f32 %v431_v57, %v430_v55 }
  0xd0   :  { %v400_v59 = vmul.f32 %v382_v56, %v281_v15 }
  0xd2   :  { %v433_v62 = vsel %vm401_vm1, %v400_v59, 0.0 }
  0xd3   :  { %v434_v0 = vadd.f32 %v433_v62, %v432_v60 }
  0xd5   :  { %v435_v2 = vrot.slane %v434_v0, 4 }
  0xd7   :  { %v436_v6 = vadd.f32 %v435_v2, %v434_v0 }
  0xd9   :  { %v437_v7 = vrot.slane %v436_v6, 2 }
  0xdb   :  { %v438_v14 = vadd.f32 %v437_v7, %v436_v6 }
  0xdd   :  { %v439_v10 = vrot.slane %v438_v14, 1 }
  0xdf   :  { %v440_v11 = vadd.f32 %v439_v10, %v438_v14 }
  0xe1   :  { %442 = vst.msk [vmem:[#allocation2] sm:$0x1] %vm441_vm2, %v440_v11 }
  0xe2   :  { %453 = dma.vmem_to_hbm [thread:$0]  %s449_s10, 16, %s451_s13, [#allocation3]  }
  0xe3   :  { %513 = dma.done.wait [#allocation3], 16  }
  0xe4   :  { %514 = vsyncadd [#allocation3], 4294967280 }
  0xe5   :  { %458 = vsyncpa [#allocation3], 1 }

</bundles_post_ra>
